<compile_context>
chip_gen: v7x
topology: tpu7x:2x2x1
jax: 0.10.0
libtpu: 0.0.40
codegen_flags: <defaults>
</compile_context>

<pallas_src>
import functools
import math

import jax
import jax.numpy as jnp
from jax import lax
from jax.experimental import pallas as pl
from jax.experimental.pallas import tpu as pltpu


def _softplus(x):
    # Stable softplus using only exp/log/abs/max (Mosaic-supported); matches
    # torch.nn.Softplus to f32 precision (saturates to x for large x).
    return jnp.maximum(x, 0.0) + jnp.log(1.0 + jnp.exp(-jnp.abs(x)))


def _round_up(n, m):
    return ((n + m - 1) // m) * m


def _vmem_budgets():
    """(x-stream double-buffer budget, vmem_limit_bytes), generation-aware."""
    cap = 64 * 1024 * 1024
    try:
        cap = int(getattr(pltpu.get_tpu_info(), "vmem_capacity_bytes", cap))
    except Exception:
        pass
    if cap >= 100 * 1024 * 1024:                 # v5e / v6e: 128 MiB physical
        return 32 * 1024 * 1024, 64 * 1024 * 1024
    return 24 * 1024 * 1024, 48 * 1024 * 1024    # v7x: 64 MiB physical


def _choose_s_tile(b, dp, itemsize, s_rows, budget):
    # Double-buffered x tile <= budget; big tiles amortize the ~0.35 us
    # per-grid-step overhead (the old 2048-row cap is removed per review).
    rows = budget // max(1, 2 * b * dp * itemsize)
    rows = int(max(8, min(rows, 16384, _round_up(s_rows, 8))))
    return max(8, (rows // 8) * 8)


# ---------------------------------------------------------------------------
# Kernel 1: HBM streaming reduction  sum_s x[:, s, :]  ->  per-split partials.
# ---------------------------------------------------------------------------
def _stream_sum_kernel(x_ref, partial_ref, *, sp_total, s_tile, tiles_per_split):
    c = pl.program_id(0)     # split (sharded across TensorCores on v7x)
    s = pl.program_id(1)     # tile within the split (reduction axis)

    @pl.when(s == 0)
    def _init():
        partial_ref[...] = jnp.zeros_like(partial_ref)

    start = (c * tiles_per_split + s) * s_tile   # true (unclamped) row start

    @pl.when(start + s_tile <= sp_total)
    def _full_tile():
        partial_ref[...] += jnp.sum(x_ref[...].astype(jnp.float32), axis=1)

    @pl.when(start + s_tile > sp_total)
    def _ragged_tile():
        # Last / clamped tile: zero out rows beyond the true extent so the
        # (undefined) out-of-range VMEM contents never reach the accumulator.
        rows = lax.broadcasted_iota(jnp.int32, x_ref.shape, 1)
        valid = sp_total - start
        tile = jnp.where(rows < valid, x_ref[...].astype(jnp.float32), 0.0)
        partial_ref[...] += jnp.sum(tile, axis=1)


# ---------------------------------------------------------------------------
# Kernel 2: tiny finalize — pooled mean, fused gate matmul, noisy top-k gating.
# ---------------------------------------------------------------------------
def _gating_finalize_kernel(partial_ref, w_ref, noise_ref,
                            clean_ref, logits_ref, std_ref, topv_ref, topi_ref,
                            gates_ref, *, s_total, top_k, kp1, noise_eps,
                            training):
    pooled = jnp.sum(partial_ref[...], axis=0) * (1.0 / s_total)     # (B, Dp)

    # Fused clean|noise gate matmul: one (Dp, 2E) weight, one MXU push.
    fused = jnp.dot(pooled, w_ref[...], preferred_element_type=jnp.float32)
    e = noise_ref.shape[1]
    clean = fused[:, :e]
    raw_noise = fused[:, e:]
    std = _softplus(raw_noise) + noise_eps
    logits = clean + noise_ref[...] * std if training else clean

    clean_ref[...] = clean
    std_ref[...] = std
    logits_ref[...] = logits

    b = clean.shape[0]
    col = lax.broadcasted_iota(jnp.int32, (b, e), 1)
    colf = col.astype(jnp.float32)
    neg = jnp.float32(-1e30)

    # top-(k+1) by iterative masked argmax (E tiny -> fully unrolled); values
    # and indices are written once each with a single batched store.
    work = logits
    vals, idxs = [], []
    for _ in range(kp1):
        v = jnp.max(work, axis=1, keepdims=True)                      # (B, 1)
        idx = jnp.min(jnp.where(work == v, colf, jnp.float32(e)),
                      axis=1, keepdims=True).astype(jnp.int32)        # (B, 1)
        vals.append(v)
        idxs.append(idx)
        work = jnp.where(col == idx, neg, work)
    topv_ref[...] = jnp.concatenate(vals, axis=1)
    topi_ref[...] = jnp.concatenate(idxs, axis=1)

    # softmax over the top-k logits, scattered densely into (B, E) gates.
    exps = [jnp.exp(vals[j] - vals[0]) for j in range(top_k)]
    z = exps[0]
    for j in range(1, top_k):
        z = z + exps[j]
    inv_z = 1.0 / z
    gates = jnp.zeros_like(logits)
    for j in range(top_k):
        gates = gates + jnp.where(col == idxs[j], exps[j] * inv_z, 0.0)
    gates_ref[...] = gates


def _cv_squared(v):
    eps = 1e-6
    if v.shape[0] == 1:
        return jnp.zeros((), jnp.float32)
    v = v.astype(jnp.float32)
    return jnp.var(v, ddof=1) / (jnp.mean(v) ** 2 + eps)


def _normal_cdf(z):
    return 0.5 * (1.0 + lax.erf(z * (1.0 / math.sqrt(2.0))))


def topk_moe_forward(inputs, clean_gate, noise_gate, expert_fns, *, top_k,
                     training=True, noise_key=None, noise_epsilon=1e-3,
                     lora_type="conv2d"):
    """Forward pass of TopKMoeLayer (conv2d lora_type: pooled gating)."""
    if lora_type != "conv2d":
        # TODO(synk): 'linear' lora_type (per-token gating on the flattened
        # (B*S, D) tokens) is not implemented; only the pooled path is.
        raise NotImplementedError("only lora_type='conv2d' is implemented")

    x = jnp.asarray(inputs)                    # keep native dtype (e.g. bf16)
    if x.ndim == 4:
        b_, h_, w_, d_ = x.shape
        x3 = x.reshape(b_, h_ * w_, d_)
    elif x.ndim == 3:
        x3 = x
    else:
        raise ValueError("expected 3D or 4D input")
    B, S, D = x3.shape

    wc = jnp.asarray(clean_gate, jnp.float32)  # (D, E), used as x @ W
    wn = jnp.asarray(noise_gate, jnp.float32)
    E = wc.shape[1]
    kp1 = min(top_k + 1, E)
    k_eff = min(top_k, E)
    if training and top_k >= E:
        raise ValueError("training load path requires top_k < num_experts")

    w_fused = jnp.concatenate([wc, wn], axis=1)               # (D, 2E)

    # Lane-dense packing: with D < 128 pack P = 128 // D tokens per 128-lane
    # row via a copy-free contiguous reshape, and tile the gate weight P-fold
    # -> identical logits, 1/P the DMA descriptors, unmasked lanes.
    if D % 128 == 0:
        xk, w_k = x3, w_fused
    elif D < 128 and 128 % D == 0 and S % (128 // D) == 0:
        P = 128 // D
        xk = x3.reshape(B, S // P, P * D)                     # free reshape
        w_k = jnp.tile(w_fused, (P, 1))
    else:
        # TODO(synk): non-lane-aligned D (or S not divisible by the packing
        # factor) streams with masked lanes; pad D/S upstream for full DMA
        # efficiency instead of paying a whole-array copy here.
        xk, w_k = x3, w_fused
    Sp, Dp = xk.shape[1], xk.shape[2]

    x_budget, vmem_limit = _vmem_budgets()
    s_tile = _choose_s_tile(B, Dp, xk.dtype.itemsize, Sp, x_budget)
    n_tiles = -(-Sp // s_tile)
    nsplit = 2 if n_tiles >= 2 else 1          # leading "parallel" axis (v7x: 2 TCs)
    tiles_per_split = -(-n_tiles // nsplit)

    if training:
        if noise_key is None:
            noise_key = jax.random.PRNGKey(0)
        noise = jax.random.normal(noise_key, (B, E), jnp.float32)
    else:
        noise = jnp.zeros((B, E), jnp.float32)

    # ---- streaming reduction over S (the HBM-bound part) -------------------
    stream_kernel = functools.partial(
        _stream_sum_kernel, sp_total=Sp, s_tile=s_tile,
        tiles_per_split=tiles_per_split)

    def x_map(c, s):
        t = c * tiles_per_split + s
        return (0, jnp.minimum(t, n_tiles - 1), 0)   # clamp keeps DMA in range

    partials = pl.pallas_call(
        stream_kernel,
        grid=(nsplit, tiles_per_split),
        in_specs=[pl.BlockSpec((B, s_tile, Dp), x_map)],
        out_specs=pl.BlockSpec((None, B, Dp), lambda c, s: (c, 0, 0)),
        out_shape=jax.ShapeDtypeStruct((nsplit, B, Dp), jnp.float32),
        compiler_params=pltpu.CompilerParams(
            dimension_semantics=("parallel", "arbitrary"),
            vmem_limit_bytes=vmem_limit),
        cost_estimate=pl.CostEstimate(
            flops=int(B) * int(Sp) * int(Dp),
            transcendentals=0,
            bytes_accessed=int(B) * int(Sp) * int(Dp) * int(xk.dtype.itemsize)
                           + int(nsplit) * int(B) * int(Dp) * 4),
    )(xk)

    # ---- tiny finalize: gate matmuls, top-(k+1), softmax, dense scatter -----
    fin_kernel = functools.partial(
        _gating_finalize_kernel, s_total=float(S), top_k=k_eff, kp1=kp1,
        noise_eps=float(noise_epsilon), training=bool(training))

    clean, logits, std, topv, topi, gates = pl.pallas_call(
        fin_kernel,
        out_shape=(
            jax.ShapeDtypeStruct((B, E), jnp.float32),    # clean_logits
            jax.ShapeDtypeStruct((B, E), jnp.float32),    # logits (noisy if train)
            jax.ShapeDtypeStruct((B, E), jnp.float32),    # noise_stddev
            jax.ShapeDtypeStruct((B, kp1), jnp.float32),  # top-(k+1) values
            jax.ShapeDtypeStruct((B, kp1), jnp.int32),    # top-(k+1) indices
            jax.ShapeDtypeStruct((B, E), jnp.float32),    # dense gates (pre-fp16)
        ),
    )(partials, w_k, noise)

    top_k_indices = topi[:, :k_eff]
    top_k_logits = topv[:, :k_eff]
    # Replicate the torch scatter-via-fp16 round trip on the final gates.
    gates = gates.astype(jnp.float16).astype(jnp.float32)

    if training:
        thr_in = topv[:, top_k][:, None]           # (k+1)-th largest noisy logit
        thr_out = topv[:, top_k - 1][:, None]      # k-th largest
        is_in = logits > thr_in
        prob_in = _normal_cdf((clean - thr_in) / std)
        prob_out = _normal_cdf((clean - thr_out) / std)
        load = jnp.where(is_in, prob_in, prob_out).sum(axis=0)
        balance_loss = _cv_squared(gates.sum(axis=0)) + _cv_squared(load)
    else:
        load = (gates > 0).sum(axis=0).astype(jnp.float32)
        balance_loss = None
    # NOTE: the reference also computes weights = top_k_logits / sum(...) but
    # never uses it downstream; omitted.

    # Expert dispatch / combine.  The torch reference does
    #   results[batch_idx] += expert(inputs[batch_idx])
    # i.e. UNWEIGHTED outputs for selected rows -> a binary-mask combine is the
    # exact equivalent (top-k indices are distinct per row).  Inputs stay bf16;
    # experts accumulate in f32.
    # TODO(synk): for large E, gather only the selected rows instead of the
    # dense masked combine; experts are external nn.Modules in the original
    # layer, replaced here by user-supplied JAX callables.
    results = None
    if expert_fns:
        for i, fn in enumerate(expert_fns):
            sel = jnp.any(top_k_indices == i, axis=1)              # (B,)
            out_i = fn(x3)
            out_i = out_i * sel[:, None, None].astype(out_i.dtype)
            results = out_i if results is None else results + out_i

    return {
        "moe_results": results,
        "moe_experts": top_k_indices,
        "moe_type": lora_type,
        "gates": gates,
        "load": load,
        "balance_loss": balance_loss,
        "clean_logits": clean,
        "logits": logits,
        "noise_stddev": std,
        "top_k_logits": top_k_logits,
        "noise": noise,
    }


if __name__ == "__main__":
    key = jax.random.PRNGKey(0)
    kx, kc, kn, ke, knoise = jax.random.split(key, 5)

    # Small shapes consistent with the module's conv2d path.
    B, H, W, D = 2, 16, 16, 32
    E, TOP_K = 4, 2

    x = jax.random.normal(kx, (B, H, W, D), jnp.float32).astype(jnp.bfloat16)
    clean_gate = 0.1 * jax.random.normal(kc, (D, E), jnp.float32)
    noise_gate = 0.1 * jax.random.normal(kn, (D, E), jnp.float32)
    expert_w = jax.random.normal(ke, (E, D, D), jnp.float32) / (D ** 0.5)
    expert_fns = [
        (lambda t, w=expert_w[i]:
         jnp.einsum("bsd,de->bse", t, w, preferred_element_type=jnp.float32))
        for i in range(E)]

    # Training-mode forward.
    out = topk_moe_forward(x, clean_gate, noise_gate, expert_fns,
                           top_k=TOP_K, training=True, noise_key=knoise)
    jax.block_until_ready((out["moe_results"], out["gates"], out["load"],
                           out["balance_loss"], out["moe_experts"]))

    # Eval-mode forward.
    out_eval = topk_moe_forward(x, clean_gate, noise_gate, expert_fns,
                                top_k=TOP_K, training=False)
    jax.block_until_ready((out_eval["moe_results"], out_eval["gates"],
                           out_eval["load"]))

    # Pure-JAX reference of the gating math (same noise sample).
    xf = x.astype(jnp.float32).reshape(B, H * W, D)
    pooled = xf.mean(axis=1)
    clean_ref = pooled @ clean_gate
    std_ref = jax.nn.softplus(pooled @ noise_gate) + 1e-3
    logits_ref = clean_ref + out["noise"] * std_ref
    topv_ref, topi_ref = jax.lax.top_k(logits_ref, TOP_K + 1)
    gk = jax.nn.softmax(topv_ref[:, :TOP_K], axis=1)
    gates_ref = jnp.zeros((B, E), jnp.float32).at[
        jnp.arange(B)[:, None], topi_ref[:, :TOP_K]].set(gk)
    gates_ref = gates_ref.astype(jnp.float16).astype(jnp.float32)

    assert jnp.allclose(out["clean_logits"], clean_ref, atol=2e-3, rtol=2e-3)
    assert jnp.allclose(out["logits"], logits_ref, atol=2e-3, rtol=2e-3)
    assert jnp.array_equal(out["moe_experts"], topi_ref[:, :TOP_K])
    assert jnp.allclose(out["gates"], gates_ref, atol=2e-3)
    assert jnp.allclose(out_eval["clean_logits"], clean_ref, atol=2e-3, rtol=2e-3)
    assert out["moe_results"].shape == (B, H * W, D)
    assert out["load"].shape == (E,) and out_eval["load"].shape == (E,)

    print("KERNEL_OK")
</pallas_src>

<mosaic_0001>
module attributes {stable_mosaic.version = 11 : i64} {
  func.func @_stream_sum_kernel(%arg0: i32, %arg1: i32, %arg2: memref<2x64x128xbf16, #tpu.memory_space<vmem>>, %arg3: memref<1x2x128xf32, #tpu.memory_space<vmem>>) attributes {dimension_semantics = [#tpu.dimension_semantics<parallel>, #tpu.dimension_semantics<arbitrary>], iteration_bounds = array<i64: 1, 1>, scalar_prefetch = 0 : i64, scratch_operands = 0 : i64, tpu.core_type = #tpu.core_type<tc>, window_params = [{transform_indices = @transform_0, window_bounds = array<i64: 2, 64, 128>}, {transform_indices = @transform_1, window_bounds = array<i64: 1, 2, 128>}]} {
    %c0_i32 = arith.constant 0 : i32
    %0 = arith.cmpi eq, %arg1, %c0_i32 : i32
    %1 = arith.extui %0 : i1 to i32
    %c0_i32_0 = arith.constant 0 : i32
    %2 = arith.cmpi ne, %1, %c0_i32_0 : i32
    scf.if %2 {
      %cst = arith.constant 0.000000e+00 : f32
      %14 = vector.broadcast %cst : f32 to vector<2x128xf32>
      %c0 = arith.constant 0 : index
      %c0_7 = arith.constant 0 : index
      %c0_8 = arith.constant 0 : index
      %15 = vector.load %arg3[%c0, %c0_7, %c0_8] : memref<1x2x128xf32, #tpu.memory_space<vmem>>, vector<1x2x128xf32>
      %16 = vector.shape_cast %15 : vector<1x2x128xf32> to vector<2x128xf32>
      %17 = vector.shape_cast %14 : vector<2x128xf32> to vector<1x2x128xf32>
      tpu.vector_store %arg3[%c0, %c0_7, %c0_8], %17 {strides = array<i32>} : memref<1x2x128xf32, #tpu.memory_space<vmem>>, vector<1x2x128xf32>,
    } else {
    }
    %c1_i32 = arith.constant 1 : i32
    %3 = arith.muli %arg0, %c1_i32 : i32
    %4 = arith.addi %3, %arg1 : i32
    %c64_i32 = arith.constant 64 : i32
    %5 = arith.muli %4, %c64_i32 : i32
    %c64_i32_1 = arith.constant 64 : i32
    %6 = arith.addi %5, %c64_i32_1 : i32
    %c64_i32_2 = arith.constant 64 : i32
    %7 = arith.cmpi sle, %6, %c64_i32_2 : i32
    %8 = arith.extui %7 : i1 to i32
    %c0_i32_3 = arith.constant 0 : i32
    %9 = arith.cmpi ne, %8, %c0_i32_3 : i32
    scf.if %9 {
      %c0 = arith.constant 0 : index
      %c0_7 = arith.constant 0 : index
      %c0_8 = arith.constant 0 : index
      %14 = vector.load %arg3[%c0, %c0_7, %c0_8] : memref<1x2x128xf32, #tpu.memory_space<vmem>>, vector<1x2x128xf32>
      %15 = vector.shape_cast %14 : vector<1x2x128xf32> to vector<2x128xf32>
      %c0_9 = arith.constant 0 : index
      %c0_10 = arith.constant 0 : index
      %c0_11 = arith.constant 0 : index
      %16 = vector.load %arg2[%c0_9, %c0_10, %c0_11] : memref<2x64x128xbf16, #tpu.memory_space<vmem>>, vector<2x64x128xbf16>
      %17 = arith.extf %16 : vector<2x64x128xbf16> to vector<2x64x128xf32>
      %cst = arith.constant dense<0.000000e+00> : vector<2x128xf32>
      %18 = vector.multi_reduction <add>, %17, %cst [1] : vector<2x64x128xf32> to vector<2x128xf32>
      %19 = arith.addf %15, %18 : vector<2x128xf32>
      %c0_12 = arith.constant 0 : index
      %c0_13 = arith.constant 0 : index
      %c0_14 = arith.constant 0 : index
      %20 = vector.load %arg3[%c0_12, %c0_13, %c0_14] : memref<1x2x128xf32, #tpu.memory_space<vmem>>, vector<1x2x128xf32>
      %21 = vector.shape_cast %20 : vector<1x2x128xf32> to vector<2x128xf32>
      %22 = vector.shape_cast %19 : vector<2x128xf32> to vector<1x2x128xf32>
      tpu.vector_store %arg3[%c0_12, %c0_13, %c0_14], %22 {strides = array<i32>} : memref<1x2x128xf32, #tpu.memory_space<vmem>>, vector<1x2x128xf32>,
    } else {
    }
    %c64_i32_4 = arith.constant 64 : i32
    %10 = arith.addi %5, %c64_i32_4 : i32
    %c64_i32_5 = arith.constant 64 : i32
    %11 = arith.cmpi sgt, %10, %c64_i32_5 : i32
    %12 = arith.extui %11 : i1 to i32
    %c0_i32_6 = arith.constant 0 : i32
    %13 = arith.cmpi ne, %12, %c0_i32_6 : i32
    scf.if %13 {
      %14 = tpu.iota {dimensions = array<i32: 1>} : vector<2x64x128xi32>
      %c64_i32_7 = arith.constant 64 : i32
      %15 = arith.subi %c64_i32_7, %5 : i32
      %16 = vector.broadcast %15 : i32 to vector<2x64x128xi32>
      %17 = arith.cmpi slt, %14, %16 : vector<2x64x128xi32>
      %c0 = arith.constant 0 : index
      %c0_8 = arith.constant 0 : index
      %c0_9 = arith.constant 0 : index
      %18 = vector.load %arg2[%c0, %c0_8, %c0_9] : memref<2x64x128xbf16, #tpu.memory_space<vmem>>, vector<2x64x128xbf16>
      %19 = arith.extf %18 : vector<2x64x128xbf16> to vector<2x64x128xf32>
      %cst = arith.constant 0.000000e+00 : f32
      %20 = vector.broadcast %cst : f32 to vector<2x64x128xf32>
      %21 = arith.select %17, %19, %20 : vector<2x64x128xi1>, vector<2x64x128xf32>
      %c0_10 = arith.constant 0 : index
      %c0_11 = arith.constant 0 : index
      %c0_12 = arith.constant 0 : index
      %22 = vector.load %arg3[%c0_10, %c0_11, %c0_12] : memref<1x2x128xf32, #tpu.memory_space<vmem>>, vector<1x2x128xf32>
      %23 = vector.shape_cast %22 : vector<1x2x128xf32> to vector<2x128xf32>
      %cst_13 = arith.constant dense<0.000000e+00> : vector<2x128xf32>
      %24 = vector.multi_reduction <add>, %21, %cst_13 [1] : vector<2x64x128xf32> to vector<2x128xf32>
      %25 = arith.addf %23, %24 : vector<2x128xf32>
      %c0_14 = arith.constant 0 : index
      %c0_15 = arith.constant 0 : index
      %c0_16 = arith.constant 0 : index
      %26 = vector.load %arg3[%c0_14, %c0_15, %c0_16] : memref<1x2x128xf32, #tpu.memory_space<vmem>>, vector<1x2x128xf32>
      %27 = vector.shape_cast %26 : vector<1x2x128xf32> to vector<2x128xf32>
      %28 = vector.shape_cast %25 : vector<2x128xf32> to vector<1x2x128xf32>
      tpu.vector_store %arg3[%c0_14, %c0_15, %c0_16], %28 {strides = array<i32>} : memref<1x2x128xf32, #tpu.memory_space<vmem>>, vector<1x2x128xf32>,
    } else {
    }
    return
  }
  func.func @transform_0(%arg0: i32, %arg1: i32) -> (i32, i32, i32) {
    %c1_i32 = arith.constant 1 : i32
    %0 = arith.muli %arg0, %c1_i32 : i32
    %1 = arith.addi %0, %arg1 : i32
    %c0_i32 = arith.constant 0 : i32
    %2 = arith.minsi %1, %c0_i32 : i32
    %c0_i32_0 = arith.constant 0 : i32
    %c0_i32_1 = arith.constant 0 : i32
    %c0_i32_2 = arith.constant 0 : i32
    return %c0_i32_0, %2, %c0_i32_1 : i32, i32, i32
  }
  func.func @transform_1(%arg0: i32, %arg1: i32) -> (i32, i32, i32) {
    %c0_i32 = arith.constant 0 : i32
    %c0_i32_0 = arith.constant 0 : i32
    %c0_i32_1 = arith.constant 0 : i32
    return %arg0, %c0_i32, %c0_i32_0 : i32, i32, i32
  }
}

</mosaic_0001>

<bundles_post_ra>
// kernel: tpu_custom_call.1
= control target key start
LH: loop header
LB: loop body
LE: loop exit
PB: predicated region body
PF: predicated region fallthrough
CT: control target
= control target key end

     0   :  { %6 = vsyncpa [#allocation3], 0  ;;  %s364_s0 = inlined_call_operand.hbm [shape: bf16[2,64,128], index: 0, kind: input, shape index: {}]   ;;  %s365_s1 = inlined_call_operand.hbm [shape: f32[1,2,128], index: 1, kind: output, shape index: {}]  }
   0x1   :  { %7 = vsyncpa [#allocation4], 0  ;;  %s325_s6 = smov [#allocation2]   ;;  %s277_s10 = scalar_lea.hbm %s364_s0, 1024 }
   0x2   :  { %s19_s7 = sshll.u32 %s325_s6, 4  ;;  %p278_p0 = scmp.ne.s32.totalorder %s364_s0, %s277_s10  ;;  %s20_s7 = int_to_ptr.vmem [resolvable:$true] %s19_s7 }
   0x3   :  { %p281_p1 = scmp.lt.u32.totalorder %s277_s10, %s364_s0 }
   0x5   :  { %p283_p2 = pnand %p281_p1, %p278_p0 }
   0x7   :  { %286 = shalt.err (!%p283_p2)
}
   0x8   :  { %s287_s15 = scalar_lea.vmem %s20_s7, 1024  ;;  %p292_p4 = scmp.lt.s32.totalorder %s20_s7, %s20_s7 }
   0x9   :  { %p288_p3 = scmp.ne.s32.totalorder %s20_s7, %s287_s15  ;;  %p293_p5 = scmp.lt.s32.totalorder %s287_s15, %s287_s15 }
   0xb   :  { %p294_p6 = por %p293_p5, %p292_p4 }
   0xd   :  { %p295_p7 = pnand %p294_p6, %p288_p3 }
   0xf   :  { %298 = shalt.err (!%p295_p7)
}
  0x10   :  { %s326_s16 = smov 64   ;;  %s327_s17 = smov 4  }
  0x11   :  { %25 = dma.hbm_to_vmem [thread:$0]  %s364_s0, 1024, %s20_s7, [#allocation3], %s326_s16, %s326_s16, %s327_s17  }
  0x12   :  { %321 = dma.done.wait [#allocation3], 1024  }
  0x13   :  { %322 = vsyncadd [#allocation3], 4294966272  ;;  %v328_v0 = vmov 0.0   ;;  %v234_v1 = vld [vmem:[#allocation2] sm:$0xff]   ;;  %v265_v2 = vld [vmem:[#allocation2 + $0x8] sm:$0xff]   ;;  %vm106_vm0 = vcmask 1041409  }
  0x14   :  { %37 = vst [vmem:[#allocation5] sm:$0x3] %v328_v0  ;;  %v235_v3 = vunpack.c.l.bf16 %v234_v1  ;;  %v236_v4 = vunpack.c.h.bf16 %v234_v1  ;;  %v268_v5 = vld [vmem:[#allocation2 + $0x20] sm:$0xff]   ;;  %v269_v6 = vld [vmem:[#allocation2 + $0x28] sm:$0xff]   ;;  %v239_v7 = vunpack.c.l.bf16 %v265_v2  ;;  %v266_v11 = vld [vmem:[#allocation2 + $0x10] sm:$0xff]   ;;  %v240_v13 = vunpack.c.h.bf16 %v265_v2  ;;  %s329_s0 = smov [#allocation5]  }
  0x15   :  { %v251_v8 = vunpack.c.l.bf16 %v268_v5  ;;  %v252_v9 = vunpack.c.h.bf16 %v268_v5  ;;  %v255_v10 = vunpack.c.l.bf16 %v269_v6  ;;  %v270_v12 = vld [vmem:[#allocation2 + $0x30] sm:$0xff]   ;;  %v256_v14 = vunpack.c.h.bf16 %v269_v6  ;;  %v267_v21 = vld [vmem:[#allocation2 + $0x18] sm:$0xff]   ;;  %s222_s20 = sshll.u32 %s329_s0, 4  ;;  %s223_s20 = int_to_ptr.vmem [resolvable:$true] %s222_s20 }
  0x16   :  { %v78_v15 = vadd.f32 %v236_v4, %v235_v3  ;;  %v243_v17 = vunpack.c.l.bf16 %v266_v11  ;;  %v259_v18 = vunpack.c.l.bf16 %v270_v12  ;;  %v271_v22 = vld [vmem:[#allocation2 + $0x38] sm:$0xff]   ;;  %v244_v23 = vunpack.c.h.bf16 %v266_v11  ;;  %s299_s21 = scalar_lea.vmem %s223_s20, 32  ;;  %p304_p9 = scmp.lt.s32.totalorder %s223_s20, %s223_s20 }
  0x17   :  { %v91_v16 = vadd.f32 %v252_v9, %v251_v8  ;;  %v260_v24 = vunpack.c.h.bf16 %v270_v12  ;;  %v247_v27 = vunpack.c.l.bf16 %v267_v21  ;;  %v263_v28 = vunpack.c.l.bf16 %v271_v22  ;;  %p300_p8 = scmp.ne.s32.totalorder %s223_s20, %s299_s21  ;;  %p305_p10 = scmp.lt.s32.totalorder %s299_s21, %s299_s21 }
  0x18   :  { %v79_v19 = vadd.f32 %v239_v7, %v78_v15  ;;  %v248_v31 = vunpack.c.h.bf16 %v267_v21  ;;  %v264_v32 = vunpack.c.h.bf16 %v271_v22 }
  0x19   :  { %v92_v20 = vadd.f32 %v255_v10, %v91_v16  ;;  %p306_p11 = por %p305_p10, %p304_p9 }
  0x1a   :  { %v80_v25 = vadd.f32 %v240_v13, %v79_v19 }
  0x1b   :  { %v93_v26 = vadd.f32 %v256_v14, %v92_v20  ;;  %v45_v49 = vld [vmem:[#allocation5] sm:$0x3]  ;;  %p307_p12 = pnand %p306_p11, %p300_p8 }
  0x1c   :  { %v81_v29 = vadd.f32 %v243_v17, %v80_v25 }
  0x1d   :  { %v94_v30 = vadd.f32 %v259_v18, %v93_v26 }
  0x1e   :  { %v82_v33 = vadd.f32 %v244_v23, %v81_v29 }
  0x1f   :  { %v95_v34 = vadd.f32 %v260_v24, %v94_v30 }
  0x20   :  { %v83_v35 = vadd.f32 %v247_v27, %v82_v33 }
  0x21   :  { %v96_v36 = vadd.f32 %v263_v28, %v95_v34 }
  0x22   :  { %v84_v37 = vadd.f32 %v248_v31, %v83_v35 }
  0x23   :  { %v97_v38 = vadd.f32 %v264_v32, %v96_v36 }
  0x24   :  { %v85_v39 = vrot.slane %v84_v37, 4 }
  0x25   :  { %v98_v40 = vrot.slane %v97_v38, 4 }
  0x26   :  { %v86_v41 = vadd.f32 %v85_v39, %v84_v37 }
  0x27   :  { %v99_v42 = vadd.f32 %v98_v40, %v97_v38 }
  0x28   :  { %v87_v43 = vrot.slane %v86_v41, 2 }
  0x29   :  { %v100_v44 = vrot.slane %v99_v42, 2 }
  0x2a   :  { %v88_v45 = vadd.f32 %v87_v43, %v86_v41 }
  0x2b   :  { %v101_v46 = vadd.f32 %v100_v44, %v99_v42 }
  0x2c   :  { %v89_v47 = vrot.slane %v88_v45, 1 }
  0x2d   :  { %v102_v48 = vrot.slane %v101_v46, 1 }
  0x2e   :  { %v90_v50 = vadd.f32 %v89_v47, %v88_v45 }
  0x2f   :  { %v103_v51 = vadd.f32 %v102_v48, %v101_v46 }
  0x31   :  { %v107_v52 = vsel %vm106_vm0, %v103_v51, %v90_v50 }
  0x32   :  { %v109_v53 = vadd.f32 %v107_v52, %v45_v49 }
  0x34   :  { %110 = vst [vmem:[#allocation5] sm:$0x3] %v109_v53 }
  0x35   :  { %310 = shalt.err (!%p307_p12)
}
  0x36   :  { %s311_s24 = scalar_lea.hbm %s365_s1, 32 }
  0x37   :  { %p312_p13 = scmp.ne.s32.totalorder %s365_s1, %s311_s24  ;;  %p315_p0 = scmp.lt.u32.totalorder %s311_s24, %s365_s1 }
  0x39   :  { %p317_p1 = pnand %p315_p0, %p312_p13 }
  0x3b   :  { %320 = shalt.err (!%p317_p1)
}
  0x3c   :  { %225 = dma.vmem_to_hbm [thread:$0]  %s223_s20, 32, %s365_s1, [#allocation4]  }
  0x3d   :  { %323 = dma.done.wait [#allocation4], 32  }
  0x3e   :  { %324 = vsyncadd [#allocation4], 4294967264 }
  0x3f   :  { %229 = vsyncpa [#allocation3], 1 }
  0x40   :  { %230 = vsyncpa [#allocation4], 1 }

</bundles_post_ra>
